<compile_context>
chip_gen: v6e
topology: v6e:2x2x1
jax: 0.10.0
libtpu: 0.0.40
codegen_flags: <defaults>
</compile_context>

<pallas_src>
import functools

import jax
import jax.numpy as jnp
from jax import lax
from jax.experimental import pallas as pl
from jax.experimental.pallas import tpu as pltpu


_LANE = 128
_K_TILE_THRESHOLD = 2048          # tile the contraction (W) axis above this
_K_TILE = 512                     # default K-tile when W must be padded
_MIN_PALLAS_ELEMENTS = 1_000_000  # below this, plain einsum wins
_SMALL_V = 128                    # below this, fold the batch into one wide dot


def _round_up(x, m):
    return ((x + m - 1) // m) * m


def _vmem_budget_and_limit():
    """Generation-aware working-set budget and scoped-VMEM limit (bytes)."""
    cap = None
    try:
        cap = getattr(pltpu.get_tpu_info(), "vmem_capacity_bytes", None)
    except Exception:                      # query unavailable -> be conservative
        cap = None
    if not cap:
        cap = 64 * 1024 * 1024             # v7x-sized assumption
    budget = max(20 << 20, min(int(cap * 0.45), 64 << 20))
    limit = max(32 << 20, min(int(cap * 0.75), 100 << 20))
    return budget, limit


# --------------------------------------------------------------------------
# Kernels
# --------------------------------------------------------------------------
def _load_x_folded(x_ref, bn, cdtype):
    """Lane-concatenate the BN (TK, TD) slabs into one (TK, BN*TD) operand."""
    return jnp.concatenate([x_ref[b].astype(cdtype) for b in range(bn)], axis=-1)


def _gconv_kernel_simple(a_ref, x_ref, o_ref, *, cdtype, fold):
    """Single-K path: the whole contraction is done in one grid step."""
    bn, _, td = x_ref.shape
    a = a_ref[0].astype(cdtype)                       # (V, W), resident in VMEM
    if fold:
        # One wide MXU matmul instead of BN skinny (V, W) x (W, TD) dots.
        xw = _load_x_folded(x_ref, bn, cdtype)        # (W, BN*TD)
        y = jnp.dot(a, xw, preferred_element_type=jnp.float32)
        for b in range(bn):                           # static, lane-aligned slices
            o_ref[b] = y[:, b * td:(b + 1) * td].astype(o_ref.dtype)
    else:
        def body(b, carry):
            xb = x_ref[b].astype(cdtype)              # in-kernel cast (VPU)
            o_ref[b] = jnp.dot(
                a, xb, preferred_element_type=jnp.float32).astype(o_ref.dtype)
            return carry
        lax.fori_loop(0, bn, body, 0, unroll=True)


def _gconv_kernel_acc(a_ref, x_ref, o_ref, acc_ref, *, cdtype, fold, a_resident):
    """K-tiled path: accumulate partial products in an f32 VMEM scratch."""
    k = pl.program_id(2)
    bn, _, td = x_ref.shape

    @pl.when(k == 0)
    def _init():
        acc_ref[...] = jnp.zeros_like(acc_ref)

    a_idx = k if a_resident else 0                    # resident A: slice k-tile
    a = a_ref[a_idx].astype(cdtype)                   # (V, TK)
    if fold:
        xw = _load_x_folded(x_ref, bn, cdtype)        # (TK, BN*TD)
        acc_ref[...] += jnp.dot(a, xw, preferred_element_type=jnp.float32)
    else:
        def body(b, carry):
            xb = x_ref[b].astype(cdtype)
            acc_ref[b] += jnp.dot(a, xb, preferred_element_type=jnp.float32)
            return carry
        lax.fori_loop(0, bn, body, 0, unroll=True)

    @pl.when(k == pl.num_programs(2) - 1)
    def _store():
        if fold:
            for b in range(bn):
                o_ref[b] = acc_ref[:, b * td:(b + 1) * td].astype(o_ref.dtype)
        else:
            o_ref[...] = acc_ref[...].astype(o_ref.dtype)


# --------------------------------------------------------------------------
# Wrapper
# --------------------------------------------------------------------------
def gconv_pallas(x, A, *, compute_dtype=None):
    """einsum('vw,nwd->nvd', A, x) as a tiled MXU kernel."""
    N, W, D = x.shape
    V, W2 = A.shape
    assert W == W2, "A's second dim must match x's node dim"

    out_dtype = jnp.result_type(x.dtype, A.dtype)
    cdtype = jnp.dtype(compute_dtype) if compute_dtype is not None else jnp.dtype(out_dtype)
    x_item = jnp.dtype(x.dtype).itemsize
    a_item = cdtype.itemsize
    c_item = cdtype.itemsize
    out_item = jnp.dtype(out_dtype).itemsize

    budget, vmem_limit = _vmem_budget_and_limit()

    # ---- contraction (W / K) tiling ---------------------------------------
    if W <= _K_TILE_THRESHOLD:
        TK, Wp, n_k = W, W, 1                       # whole contraction, no pad
    else:
        TK = 0
        for t in (512, 640, 768, 384, 1024, 256):   # 128-multiples near 512
            if W % t == 0:
                TK = t
                break
        if TK:
            Wp = W                                  # dividing tile, no pad
        else:
            TK = _K_TILE                            # rare: pad W (extra x pass)
            Wp = _round_up(W, TK)
        n_k = Wp // TK

    # A stays fully resident if it fits comfortably; else per-K-tile blocks.
    a_resident = (n_k == 1) or (V * Wp * a_item <= budget // 3)

    def fits(bn, td):
        tot = (V * Wp * a_item) if a_resident else (2 * V * TK * a_item)
        tot += 2 * bn * TK * td * x_item            # x block, double buffered
        temp_slabs = bn if V < _SMALL_V else 1      # cast / lane-concat temp
        tot += temp_slabs * TK * td * c_item
        tot += 2 * bn * V * td * out_item           # out block, double buffered
        if n_k > 1:
            tot += bn * V * td * 4                  # f32 accumulator scratch
        return tot <= budget

    # ---- feature (D / lane) tiling -----------------------------------------
    if fits(1, D):
        TD, Dp = D, D                               # whole feature dim, no pad
    else:
        TD, Dp = None, None
        if D % _LANE == 0:                          # dividing lane tile, no pad
            for t in (1024, 512, 256, 128):
                if D % t == 0 and fits(1, t):
                    TD, Dp = t, D
                    break
        if TD is None:                              # pad D up to a big lane tile
            for t in (512, 256, 128):
                if fits(1, t):
                    TD, Dp = t, _round_up(D, t)
                    break
        if TD is None:                              # best effort; rely on limit
            TD, Dp = _LANE, _round_up(D, _LANE)

    # ---- batch elements per grid step (divisors of N only: no N padding) ---
    bn_cands = [b for b in range(1, min(N, 32) + 1) if N % b == 0]
    if Dp // TD < 2 and N >= 2:                     # keep a parallel axis >= 2
        bn_cands = [b for b in bn_cands if N // b >= 2] or [1]
    BN = 1
    for b in sorted(bn_cands, reverse=True):
        if fits(b, TD):
            BN = b
            break

    # Fold BN batch slabs into a single wide dot when V underfills MXU rows.
    fold = (BN > 1) and (V < _SMALL_V) and (TD % _LANE == 0)

    # ---- operands (pad only when strictly necessary) ------------------------
    x_p = x
    if (Wp, Dp) != (W, D):
        x_p = jnp.pad(x, ((0, 0), (0, Wp - W), (0, Dp - D)))

    A_c = A.astype(cdtype)                          # A is small: cheap one-time
    if Wp != W:
        A_c = jnp.pad(A_c, ((0, 0), (0, Wp - W)))
    if n_k > 1:
        A_c = A_c.reshape(V, n_k, TK).transpose(1, 0, 2)   # (n_k, V, TK)
    else:
        A_c = A_c[None]                                     # (1, V, W)

    grid = (N // BN, Dp // TD, n_k)

    if a_resident:
        a_spec = pl.BlockSpec((n_k, V, TK), lambda n, d, k: (0, 0, 0))
    else:
        a_spec = pl.BlockSpec((1, V, TK), lambda n, d, k: (k, 0, 0))
    x_spec = pl.BlockSpec((BN, TK, TD), lambda n, d, k: (n, k, d))
    o_spec = pl.BlockSpec((BN, V, TD), lambda n, d, k: (n, 0, d))

    if n_k > 1:
        kernel = functools.partial(_gconv_kernel_acc, cdtype=cdtype,
                                   fold=fold, a_resident=a_resident)
        acc_shape = (V, BN * TD) if fold else (BN, V, TD)
        scratch = [pltpu.VMEM(acc_shape, jnp.float32)]
    else:
        kernel = functools.partial(_gconv_kernel_simple, cdtype=cdtype, fold=fold)
        scratch = []

    a_reads = 1 if a_resident else (N // BN) * (Dp // TD)
    cost = pl.CostEstimate(
        flops=2 * N * V * W * D,
        transcendentals=0,
        bytes_accessed=(N * Wp * Dp * x_item            # x read once
                        + a_reads * V * Wp * a_item     # A read once (resident)
                        + N * V * Dp * out_item),       # out written once
    )

    out = pl.pallas_call(
        kernel,
        out_shape=jax.ShapeDtypeStruct((N, V, Dp), out_dtype),
        grid_spec=pltpu.PrefetchScalarGridSpec(
            num_scalar_prefetch=0,
            grid=grid,
            in_specs=[a_spec, x_spec],
            out_specs=o_spec,
            scratch_shapes=scratch,
        ),
        compiler_params=pltpu.CompilerParams(
            dimension_semantics=("parallel", "parallel", "arbitrary"),
            vmem_limit_bytes=vmem_limit,
        ),
        cost_estimate=cost,
    )(A_c, x_p)

    if Dp != D:                                     # slice only if D was padded
        out = out[:, :, :D]
    return out


def gconv(x, A, *, compute_dtype=None, use_pallas=None):
    """JAX equivalent of the PyTorch gconv.forward (einsum 'vw,nwd->nvd')."""
    N, W, D = x.shape
    V = A.shape[0]
    if use_pallas is None:
        use_pallas = (N * V * W * D) >= _MIN_PALLAS_ELEMENTS
    if not use_pallas:
        out_dtype = jnp.result_type(x.dtype, A.dtype)
        cdtype = jnp.dtype(compute_dtype) if compute_dtype is not None else out_dtype
        return jnp.einsum(
            "vw,nwd->nvd", A.astype(cdtype), x.astype(cdtype),
            preferred_element_type=jnp.float32,
        ).astype(out_dtype)
    return gconv_pallas(x, A, compute_dtype=compute_dtype)


if __name__ == "__main__":
    key = jax.random.PRNGKey(0)
    keys = jax.random.split(key, 8)

    def ref_einsum(xx, aa):
        return jnp.einsum("vw,nwd->nvd", aa, xx, precision="highest")

    # 1) Small sanity case (forces the Pallas path; full-dim blocks, BN=1).
    N, V, W, D = 2, 8, 16, 32
    x = jax.random.normal(keys[0], (N, W, D), dtype=jnp.float32)
    A = jax.random.normal(keys[1], (V, W), dtype=jnp.float32)
    out = jax.block_until_ready(gconv(x, A, use_pallas=True))
    assert out.shape == (N, V, D)
    assert jnp.allclose(out, ref_einsum(x, A), atol=1e-3, rtol=1e-3)

    # 2) Ragged V/W/D: no padding needed thanks to full-dim blocks (12/20/200).
    N2, V2, W2, D2 = 5, 12, 20, 200
    x2 = jax.random.normal(keys[2], (N2, W2, D2), dtype=jnp.float32)
    A2 = jax.random.normal(keys[3], (V2, W2), dtype=jnp.float32)
    out2 = jax.block_until_ready(gconv(x2, A2, use_pallas=True))
    assert out2.shape == (N2, V2, D2)
    assert jnp.allclose(out2, ref_einsum(x2, A2), atol=1e-3, rtol=1e-3)

    # 3) Small-V wide-dot fold path (BN>1, V<128, lane-aligned D).
    N3, V3, W3, D3 = 4, 8, 16, 256
    x3 = jax.random.normal(keys[4], (N3, W3, D3), dtype=jnp.float32)
    A3 = jax.random.normal(keys[5], (V3, W3), dtype=jnp.float32)
    out3 = jax.block_until_ready(gconv(x3, A3, use_pallas=True))
    assert jnp.allclose(out3, ref_einsum(x3, A3), atol=1e-3, rtol=1e-3)

    # 4) K-tiled path (W > 2048): resident A sliced per k, f32 accumulator.
    N4, V4, W4, D4 = 4, 16, 2560, 256
    x4 = 0.1 * jax.random.normal(keys[6], (N4, W4, D4), dtype=jnp.float32)
    A4 = 0.1 * jax.random.normal(keys[7], (V4, W4), dtype=jnp.float32)
    out4 = jax.block_until_ready(gconv(x4, A4, use_pallas=True))
    assert jnp.allclose(out4, ref_einsum(x4, A4), atol=2e-2, rtol=2e-2)

    # 5) bf16-fed MXU with f32 accumulation (x cast in-kernel, not in HBM).
    out_bf16 = jax.block_until_ready(
        gconv(x2, A2, compute_dtype=jnp.bfloat16, use_pallas=True))
    ref_bf16 = jnp.einsum(
        "vw,nwd->nvd", A2.astype(jnp.bfloat16), x2.astype(jnp.bfloat16),
        preferred_element_type=jnp.float32).astype(out2.dtype)
    assert out_bf16.dtype == out2.dtype
    assert jnp.allclose(out_bf16, ref_bf16, atol=2e-2, rtol=2e-2)

    # 6) Auto-dispatch: tiny problem routes to plain einsum, same semantics.
    out_auto = jax.block_until_ready(gconv(x, A))
    assert jnp.allclose(out_auto, ref_einsum(x, A), atol=1e-3, rtol=1e-3)

    print("KERNEL_OK")
</pallas_src>

<mosaic_0001>
module attributes {stable_mosaic.version = 11 : i64} {
  func.func @_gconv_kernel_simple(%arg0: i32, %arg1: i32, %arg2: i32, %arg3: memref<1x8x16xf32, #tpu.memory_space<vmem>>, %arg4: memref<1x16x32xf32, #tpu.memory_space<vmem>>, %arg5: memref<1x8x32xf32, #tpu.memory_space<vmem>>) attributes {dimension_semantics = [#tpu.dimension_semantics<parallel>, #tpu.dimension_semantics<parallel>, #tpu.dimension_semantics<arbitrary>], iteration_bounds = array<i64: 2, 1, 1>, scalar_prefetch = 0 : i64, scratch_operands = 0 : i64, tpu.core_type = #tpu.core_type<tc>, window_params = [{pipeline_mode = #tpu.pipeline_mode<synchronous>, transform_indices = @transform_0, window_bounds = array<i64: 1, 8, 16>}, {transform_indices = @transform_1, window_bounds = array<i64: 1, 16, 32>}, {transform_indices = @transform_2, window_bounds = array<i64: 1, 8, 32>}]} {
    %c0 = arith.constant 0 : index
    %c0_0 = arith.constant 0 : index
    %c0_1 = arith.constant 0 : index
    %0 = vector.load %arg3[%c0, %c0_0, %c0_1] : memref<1x8x16xf32, #tpu.memory_space<vmem>>, vector<1x8x16xf32>
    %1 = vector.shape_cast %0 : vector<1x8x16xf32> to vector<8x16xf32>
    %c0_i32 = arith.constant 0 : i32
    %2 = arith.index_cast %c0_i32 : i32 to index
    %c0_2 = arith.constant 0 : index
    %c0_3 = arith.constant 0 : index
    %3 = vector.load %arg4[%2, %c0_2, %c0_3] : memref<1x16x32xf32, #tpu.memory_space<vmem>>, vector<1x16x32xf32>
    %4 = vector.shape_cast %3 : vector<1x16x32xf32> to vector<16x32xf32>
    %cst = arith.constant dense<0.000000e+00> : vector<8x32xf32>
    %5 = tpu.matmul %1, %4, %cst {dimension_numbers = #tpu.dot_dimension_numbers<[1], [0], [0], [1], [0, 0, 1, 1], [], []>} : vector<8x16xf32>, vector<16x32xf32>, vector<8x32xf32> -> vector<8x32xf32>
    %6 = arith.index_cast %c0_i32 : i32 to index
    %c0_4 = arith.constant 0 : index
    %c0_5 = arith.constant 0 : index
    %7 = vector.load %arg5[%6, %c0_4, %c0_5] : memref<1x8x32xf32, #tpu.memory_space<vmem>>, vector<1x8x32xf32>
    %8 = vector.shape_cast %7 : vector<1x8x32xf32> to vector<8x32xf32>
    %9 = vector.shape_cast %5 : vector<8x32xf32> to vector<1x8x32xf32>
    tpu.vector_store %arg5[%6, %c0_4, %c0_5], %9 {strides = array<i32>} : memref<1x8x32xf32, #tpu.memory_space<vmem>>, vector<1x8x32xf32>,
    %c1_i32 = arith.constant 1 : i32
    return
  }
  func.func @transform_0(%arg0: i32, %arg1: i32, %arg2: i32) -> (i32, i32, i32) {
    %c0_i32 = arith.constant 0 : i32
    %c0_i32_0 = arith.constant 0 : i32
    %c0_i32_1 = arith.constant 0 : i32
    %c0_i32_2 = arith.constant 0 : i32
    return %c0_i32, %c0_i32_0, %c0_i32_1 : i32, i32, i32
  }
  func.func @transform_1(%arg0: i32, %arg1: i32, %arg2: i32) -> (i32, i32, i32) {
    %c0_i32 = arith.constant 0 : i32
    return %arg0, %arg2, %arg1 : i32, i32, i32
  }
  func.func @transform_2(%arg0: i32, %arg1: i32, %arg2: i32) -> (i32, i32, i32) {
    %c0_i32 = arith.constant 0 : i32
    %c0_i32_0 = arith.constant 0 : i32
    return %arg0, %c0_i32, %arg1 : i32, i32, i32
  }
}

</mosaic_0001>

<bundles_post_ra>
// kernel: tpu_custom_call.1
= control target key start
LH: loop header
LB: loop body
LE: loop exit
PB: predicated region body
PF: predicated region fallthrough
CT: control target
= control target key end

     0   :  { %7 = vsyncpa [#allocation3], 0  ;;  %s836_s0 = inlined_call_operand.hbm [shape: f32[1,8,16], index: 0, kind: input, shape index: {}]   ;;  %s837_s1 = inlined_call_operand.hbm [shape: f32[2,16,32], index: 1, kind: input, shape index: {}]   ;;  %s838_s2 = inlined_call_operand.hbm [shape: f32[2,8,32], index: 2, kind: output, shape index: {}]  }
   0x1   :  { %8 = vsyncpa [#allocation6], 0 }
   0x2   :  { %10 = vsyncpa [#allocation6 + $0x1], 0 }
   0x3   :  { %11 = vsyncpa [#allocation4], 0 }
   0x4   :  { %13 = vsyncpa [#allocation4 + $0x1], 0  ;;  %s660_s9 = smov 0   ;;  %s662_s10 = smov 0  }
   0x5   :  { %s664_s11 = smov 0   ;;  %s666_s12 = smov 0  }
   0x6   :  { %s668_s13 = smov 0   ;;  %s670_s14 = smov 0  }
   0x7 LB: > { %s393_s15 = sadd.s32 4294967295, %s636_s14   ;;  %s394_s16 = sadd.s32 4294967294, %s636_s14   ;;  %s636_s14 = sphi %s670_s14, %s19_s14   ;;  %s632_s13 = sphi %s668_s13, %s857_s13   ;;  %s628_s12 = sphi %s666_s12, %s856_s12   ;;  %s624_s11 = sphi %s664_s11, %s855_s11   ;;  %s620_s10 = sphi %s662_s10, %s854_s10   ;;  %s616_s9 = sphi %s660_s9, %s853_s9  }
   0x8   : > { %s70_s17 = sadd.s32 1, %s624_s11  ;;  %p77_p0 = scmp.ne.s32.totalorder %s624_s11, %s620_s10 }
   0x9   : > { %p78_p1 = scmp.eq.s32.totalorder %s636_s14, 0  ;;  %p83_p2 = scmp.ne.s32.totalorder %s620_s10, %s616_s9 }
   0xa   : > { %p698_p3 = scmp.eq.s32.totalorder %s393_s15, 0  ;;  %p109_p4 = scmp.eq.s32.totalorder %s393_s15, 1 }
   0xb   : > { %p702_p5 = por %p78_p1, %p77_p0  ;;  %p115_p6 = scmp.eq.s32.totalorder %s394_s16, 1 }
   0xc   : > { %p708_p7 = por %p698_p3, %p83_p2  ;;  %p712_p8 = por %p109_p4, %p77_p0 }
   0xd   : > { %p716_p9 = por %p115_p6, %p83_p2  ;;  %p395_p10 = scmp.ge.s32.totalorder %s636_s14, 1 }
   0xe   : > { %s843_s20 = scalar_select %p708_p7, 1, 0 }
   0xf   : > { %s844_s21 = scalar_select %p712_p8, 1, 0 }
  0x10   : > { %s845_s22 = scalar_select %p716_p9, 1, 0 }
  0x11   : > { %p122_p11 = scmp.lt.s32.totalorder %s636_s14, 3  ;;  %s638_s24 = smov [#allocation2]  }
  0x12   : > { %s135_s25 = sshll.u32 %s638_s24, 4  ;;  %p442_p1 = scmp.lt.s32.totalorder %s636_s14, 2  ;;  %s136_s25 = int_to_ptr.vmem [resolvable:$true] %s135_s25 }
  0x13   : > { %p723_p13 = pnand %p395_p10, %p122_p11  ;;  %s38_s28 = sadd.s32 1, %s632_s13 }
  0x14   : > { %p732_p4 = pnand %p442_p1, %p702_p5  ;;  %p40_p6 = scmp.ge.s32.totalorder %s38_s28, 2 }
  0x15   : > { %p429_p0 = pneg %p723_p13  ;;  %s146_s29 = sand.u32 1, %s624_s11  }
  0x16   : > { %s509_s30 = scalar_lea.vmem %s136_s25, 128  ;;  %p517_p8 = scmp.lt.s32.totalorder %s136_s25, %s136_s25 }
  0x17   : > { %p738_p2 = pnand %p429_p0, %p698_p3  ;;  %p510_p11 = scmp.ne.s32.totalorder %s136_s25, %s509_s30 }
  0x18   : > { %p518_p5 = scmp.lt.s32.totalorder %s509_s30, %s509_s30 }
  0x19   : > { %p500_p10 = pneg %p738_p2 }
  0x1a   : > { %p519_p1 = por %p518_p5, %p517_p8 }
  0x1b   : > { %p512_p12 = pnand %p510_p11, %p500_p10 }
  0x1d   : > { %p513_p9 = pneg %p512_p12 }
  0x1f   : > { %p520_p7 = pnand %p519_p1, %p513_p9 }
  0x21   : > { %523 = shalt.err (!%p520_p7)
}
  0x22   : > { %432 = dma.hbm_to_vmem [thread:$0]  (!%p738_p2), %s836_s0, 128, %s136_s25, [#allocation3]  }
  0x23   : > { %s859_s28 = smov (%p40_p6, %s38_s28), 0  ;;  %s398_s5 = sshll.u32 %s146_s29, 4 }
  0x24   : > { %s63_s6 = ssub.s32 %s632_s13, %s859_s28  ;;  %s410_s7 = sshll.u32 %s632_s13, 8 }
  0x25   : > { %p68_p12 = scmp.eq.s32.totalorder %s63_s6, 0  ;;  %s159_s16 = scalar_lea.hbm %s837_s1, %s410_s7 }
  0x26   : > { %s150_s19 = scalar_lea.vmem [#allocation5], %s398_s5  ;;  %s147_s30 = scalar_lea.sflag [#allocation6], %s146_s29 }
  0x27   : > { %s160_s24 = sshll.u32 %s150_s19, 4  ;;  %p526_p7 = pneg %p732_p4  ;;  %s161_s24 = int_to_ptr.vmem [resolvable:$true] %s160_s24 }
  0x28   : > { %s762_s27 = scalar_select %p68_p12, %s624_s11, %s70_s17  }
  0x29   : > { %s537_s25 = scalar_lea.vmem %s161_s24, 256  ;;  %s639_s3 = smov [#allocation5]  }
  0x2a   : > { %p538_p8 = scmp.ne.s32.totalorder %s161_s24, %s537_s25  ;;  %s542_s4 = sshll.u32 %s639_s3, 4  ;;  %s543_s4 = int_to_ptr.vmem [resolvable:$false] %s542_s4 }
  0x2b   : > { %s544_s6 = scalar_lea.vmem %s543_s4, 512  ;;  %p545_p2 = scmp.lt.s32.totalorder %s161_s24, %s543_s4 }
  0x2c   : > { %p540_p9 = pnand %p538_p8, %p526_p7  ;;  %p546_p6 = scmp.lt.s32.totalorder %s544_s6, %s537_s25 }
  0x2e   : > { %p541_p0 = pneg %p540_p9  ;;  %p547_p10 = por %p546_p6, %p545_p2 }
  0x30   : > { %p548_p11 = pnand %p547_p10, %p541_p0 }
  0x32   : > { %551 = shalt.err (!%p548_p11)
}
  0x33   : > { %s640_s5 = smov 128   ;;  %s641_s17 = smov 8  }
  0x34   : > { %436 = dma.hbm_to_vmem [thread:$0]  (!%p732_p4), %s159_s16, 256, %s161_s24, %s147_s30, %s640_s5, %s640_s5, %s641_s17  }
  0x35   : > { %172 = sbr.rel (%p723_p13) target bundleno = 275 (0x113), region = 28 }
  0x3a   : > { %603 = dma.done.wait (%p698_p3), [#allocation3], 128  }
  0x3b   : > { %605 = vsyncadd (%p698_p3), [#allocation3], 4294967168  ;;  %s775_s29 = sand.u32 1, %s620_s10   ;;  %p849_p5 = scmp.ne.s32.totalorder %s843_s20, 0 }
  0x3c   : > { %s403_s7 = sshll.u32 %s775_s29, 4  ;;  %s179_s8 = scalar_lea.sflag [#allocation6], %s775_s29 }
  0x3d   : > { %s182_s15 = scalar_lea.vmem [#allocation5], %s403_s7 }
  0x3e   : > { %607 = dma.done.wait (%p849_p5), %s179_s8, 256  }
  0x3f   : > { %609 = vsyncadd (%p849_p5), %s179_s8, 4294967040  ;;  %v642_v0 = vmov 0.0   ;;  %vm643_vm0 = vmmov 0   ;;  %v206_v1 = vld [vmem:[%s182_s15 + $0x8] sm:$0xff]  ;;  %v205_v2 = vld [vmem:[%s182_s15] sm:$0xff]  ;;  %vm207_vm1 = vcmask 130048  }
  0x40   : > { %414 = vmatprep.subr.mxu0 %v642_v0  ;;  %418 = vmatprep.mubr.msk.f32.mxu0 %vm643_vm0, %v642_v0  ;;  %v204_v3 = vld [vmem:[#allocation2] sm:$0xff]  ;;  %s404_s18 = sshll.u32 %s775_s29, 3  ;;  %s407_s23 = sshll.u32 %s628_s12, 7  ;;  %vm281_vm2 = vcmask 261120  }
  0x41   : > { %415 = vmatpush3.msra.mxu0 %v206_v1  ;;  %s202_s20 = scalar_lea.vmem [#allocation7], %s404_s18  ;;  %s788_s24 = scalar_lea.hbm %s838_s2, %s407_s23 }
  0x42   : > { %416 = vmatprep.subr.mxu0 %v642_v0  ;;  %s298_s26 = sshll.u32 %s202_s20, 4  ;;  %s284_s30 = scalar_lea.sflag [#allocation4], %s775_s29  ;;  %s790_s26 = int_to_ptr.vmem [resolvable:$true] %s298_s26 }
  0x43   : > { %417 = vmatpush3.msra.mxu0 %v205_v2  ;;  %s552_s25 = scalar_lea.vmem %s790_s26, 128  ;;  %p850_p13 = scmp.ne.s32.totalorder %s844_s21, 0 }
  0x44   : > { %419 = vmatmul.mubr.msk.f32.vlgmr.msra.gmra.mxu0 %vm207_vm1, %v204_v3  ;;  %p553_p3 = scmp.ne.s32.totalorder %s790_s26, %s552_s25  ;;  %s644_s12 = smov [#allocation7]  }
  0x45   : > { %s556_s3 = sshll.u32 %s644_s12, 4  ;;  %s557_s3 = int_to_ptr.vmem [resolvable:$false] %s556_s3 }
  0x46   : > { %p554_p4 = pnand %p553_p3, %p850_p13  ;;  %s558_s4 = scalar_lea.vmem %s557_s3, 256 }
  0x47   : > { %p559_p12 = scmp.lt.s32.totalorder %s790_s26, %s557_s3  ;;  %p560_p7 = scmp.lt.s32.totalorder %s558_s4, %s552_s25 }
  0x48   : > { %p555_p1 = pneg %p554_p4 }
  0x49   : > { %p561_p8 = por %p560_p7, %p559_p12 }
  0x4b   : > { %p562_p9 = pnand %p561_p8, %p555_p1 }
 0x104   : > { %v277_v4 = vpop.f32.mrf.mxu0 }
 0x105   : > { %282 = vst.msk [vmem:[%s202_s20] sm:$0xff] %vm281_vm2, %v277_v4 }
 0x106   : > { %v420_v5 = vpop.f32.mrf.mxu0 }
 0x107   : > { %565 = shalt.err (!%p562_p9)
}
 0x108   : > { %s566_s6 = scalar_lea.hbm %s788_s24, 128  ;;  %s570_s29 = scalar_lea.hbm %s838_s2, 256 }
 0x109   : > { %p567_p0 = scmp.ne.s32.totalorder %s788_s24, %s566_s6  ;;  %p571_p10 = scmp.lt.s32.totalorder %s788_s24, %s838_s2 }
 0x10a   : > { %p572_p11 = scmp.lt.s32.totalorder %s570_s29, %s566_s6 }
 0x10b   : > { %p568_p2 = pnand %p567_p0, %p850_p13 }
 0x10c   : > { %p573_p5 = por %p572_p11, %p571_p10 }
 0x10d   : > { %p569_p6 = pneg %p568_p2 }
 0x10f   : > { %p574_p3 = pnand %p573_p5, %p569_p6 }
 0x111   : > { %577 = shalt.err (!%p574_p3)
}
 0x112   : > { %427 = dma.vmem_to_hbm [thread:$0]  (%p850_p13), %s790_s26, 128, %s788_s24, %s284_s30  }
 0x113 PF: > { %s310_s15 = sand.u32 1, %s616_s9   ;;  %p851_p4 = scmp.ne.s32.totalorder %s845_s22, 0 }
 0x114   : > { %p852_p1 = scmp.ge.s32.totalorder %s636_s14, 2  ;;  %s311_s18 = scalar_lea.sflag [#allocation4], %s310_s15 }
 0x116   : > { %p438_p12 = pnand %p852_p1, %p851_p4 }
 0x118   : > { %p439_p7 = pneg %p438_p12 }
 0x11a   : > { %611 = dma.done.wait (%p439_p7), %s311_s18, 128  }
 0x11b   : > { %613 = vsyncadd (%p439_p7), %s311_s18, 4294967168  ;;  %s19_s14 = sadd.s32 1, %s636_s14   ;;  %s853_s9 = smov %s620_s10 }
 0x11c   : > { %p16_p8 = scmp.ge.s32.totalorder %s19_s14, 4   ;;  %s854_s10 = smov %s624_s11 }
 0x11d   : > { %s855_s11 = smov %s762_s27  ;;  %s856_s12 = smov %s632_s13 }
 0x11e   : > { %s857_s13 = smov %s859_s28  ;;  %18 = sbr.rel (!%p16_p8) target bundleno = 7 (0x7), region = 78 }
 0x123   :  { %316 = vsyncpa [#allocation3], 1 }
 0x124   :  { %318 = vsyncpa [#allocation3 + $0x1], 1 }
 0x125   :  { %319 = vsyncpa [#allocation6], 1 }
 0x126   :  { %321 = vsyncpa [#allocation6 + $0x1], 1 }
 0x127   :  { %322 = vsyncpa [#allocation4], 1 }
 0x128   :  { %324 = vsyncpa [#allocation4 + $0x1], 1 }

</bundles_post_ra>
